<compile_context>
chip_gen: v7x
topology: tpu7x:2x2x1
jax: 0.10.0
libtpu: 0.0.40
codegen_flags: <defaults>
</compile_context>

<pallas_src>
import functools

import jax
import jax.numpy as jnp
from jax.experimental import pallas as pl
from jax.experimental.pallas import tpu as pltpu


def _dw_sep_kernel(x_ref, wdw_ref, dws_ref, dwb_ref, wbd_ref, pws_ref, pwb_ref,
                   o_ref, *, kh_size, kw_size, stride, tile_h, w_out, c_in):
    """Grid = (batch, h_tiles).

    x_ref   : (1, Hp, Wp*C_in)           zero-padded input, (W,C) on the lane axis
    wdw_ref : (KH*KW, W_out*C_in)        depthwise taps, tiled across W
    dws/dwb : (1, W_out*C_in)            folded BN scale/bias (depthwise), tiled
    wbd_ref : (W_out*C_in, W_out*C_out)  block-diagonal 1x1 conv weight
    pws/pwb : (1, W_out*C_out)           folded BN scale/bias (pointwise), tiled
    o_ref   : (1, tile_h, W_out*C_out)
    """
    wc_in = w_out * c_in
    row0 = pl.multiple_of(pl.program_id(1) * (tile_h * stride), tile_h * stride)

    # --- depthwise conv: accumulate the KH*KW taps on the VPU in f32 ---
    # (acc kept f32 so the path is identical on v5e, which has no bf16 VALU)
    acc = jnp.zeros((tile_h, wc_in), jnp.float32)
    for kh in range(kh_size):
        for kw in range(kw_size):
            if stride == 1:
                tap = x_ref[0, pl.ds(row0 + kh, tile_h),
                            kw * c_in:kw * c_in + wc_in]
            else:
                # stride > 1 (cold path for this config): strided row read,
                # then subsample W inside the flattened slab.
                span_w = (w_out - 1) * stride + 1
                rows = x_ref[0, pl.ds(row0 + kh, tile_h, stride=stride),
                             kw * c_in:kw * c_in + span_w * c_in]
                tap = rows.reshape(tile_h, span_w, c_in)[:, ::stride, :]
                tap = tap.reshape(tile_h, wc_in)
            acc = acc + tap * wdw_ref[kh * kw_size + kw]

    # --- depthwise BatchNorm (folded) + ReLU ---
    dw = jnp.maximum(acc * dws_ref[0] + dwb_ref[0], 0.0)

    # --- pointwise 1x1 conv: block-diagonal contraction on the MXU ---
    # DEFAULT precision (single-pass bf16 feed, f32 accumulate).
    pw = jax.lax.dot_general(
        dw, wbd_ref[...],
        dimension_numbers=(((1,), (0,)), ((), ())),
        preferred_element_type=jnp.float32)

    # --- pointwise BatchNorm (folded), lane-dense store ---
    o_ref[0] = (pw * pws_ref[0] + pwb_ref[0]).astype(o_ref.dtype)


@functools.partial(jax.jit, static_argnames=("stride", "padding", "tile_h"))
def depthwise_conv_forward(x_nchw, params, *, stride, padding, tile_h=None):
    """params = (wdw, dw_scale, dw_bias, wpw, pw_scale, pw_bias)."""
    wdw, dws, dwb, wpw, pws, pwb = params
    n, c_in, h, w = x_nchw.shape
    kh_size, kw_size = wdw.shape[0], wdw.shape[1]
    c_out = wpw.shape[1]
    h_out = (h + 2 * padding - kh_size) // stride + 1
    w_out = (w + 2 * padding - kw_size) // stride + 1

    # H tile: sublane-aligned when possible, otherwise one tile.
    if tile_h is None:
        tile_h = 8 if (h_out % 8 == 0) else h_out
    if h_out % tile_h != 0:
        tile_h = h_out
    h_tiles = h_out // tile_h

    # NCHW -> NHWC, zero-pad, flatten (W, C) onto the lane axis (boundary glue).
    x = jnp.transpose(x_nchw, (0, 2, 3, 1))
    x = jnp.pad(x, ((0, 0), (padding, padding), (padding, padding), (0, 0)))
    hp, wp = x.shape[1], x.shape[2]
    x = x.reshape(n, hp, wp * c_in)

    wc_in = w_out * c_in
    wc_out = w_out * c_out

    # Depthwise taps / BN params tiled across W to match the flattened lanes.
    wdw_flat = jnp.tile(wdw.reshape(kh_size * kw_size, 1, c_in),
                        (1, w_out, 1)).reshape(kh_size * kw_size, wc_in)
    dws_t = jnp.tile(dws.reshape(1, 1, c_in), (1, w_out, 1)).reshape(1, wc_in)
    dwb_t = jnp.tile(dwb.reshape(1, 1, c_in), (1, w_out, 1)).reshape(1, wc_in)

    # Block-diagonal pointwise weight: out[:, v*C_out+o] = sum_c dw[:, v*C_in+c]*wpw[c,o]
    w_bd = jnp.einsum("uv,co->ucvo", jnp.eye(w_out, dtype=wpw.dtype),
                      wpw).reshape(wc_in, wc_out)
    pws_t = jnp.tile(pws.reshape(1, 1, c_out), (1, w_out, 1)).reshape(1, wc_out)
    pwb_t = jnp.tile(pwb.reshape(1, 1, c_out), (1, w_out, 1)).reshape(1, wc_out)

    kernel = functools.partial(
        _dw_sep_kernel, kh_size=kh_size, kw_size=kw_size, stride=stride,
        tile_h=tile_h, w_out=w_out, c_in=c_in)

    out_flat = pl.pallas_call(
        kernel,
        out_shape=jax.ShapeDtypeStruct((n, h_out, wc_out), x_nchw.dtype),
        grid_spec=pltpu.PrefetchScalarGridSpec(
            num_scalar_prefetch=0,
            grid=(n, h_tiles),
            in_specs=[
                # padded image: constant block index along the H-tile axis ->
                # loaded once per batch element, VMEM-resident across H tiles.
                pl.BlockSpec((1, hp, wp * c_in), lambda b, t: (b, 0, 0)),
                pl.BlockSpec((kh_size * kw_size, wc_in), lambda b, t: (0, 0)),
                pl.BlockSpec((1, wc_in), lambda b, t: (0, 0)),
                pl.BlockSpec((1, wc_in), lambda b, t: (0, 0)),
                pl.BlockSpec((wc_in, wc_out), lambda b, t: (0, 0)),
                pl.BlockSpec((1, wc_out), lambda b, t: (0, 0)),
                pl.BlockSpec((1, wc_out), lambda b, t: (0, 0)),
            ],
            out_specs=pl.BlockSpec((1, tile_h, wc_out),
                                   lambda b, t: (b, t, 0)),
        ),
        compiler_params=pltpu.CompilerParams(
            dimension_semantics=("parallel", "parallel"),
            vmem_limit_bytes=32 * 1024 * 1024),
    )(x, wdw_flat, dws_t, dwb_t, w_bd, pws_t, pwb_t)

    # (N, H_out, W_out*C_out) -> NCHW
    out = out_flat.reshape(n, h_out, w_out, c_out)
    return jnp.transpose(out, (0, 3, 1, 2))


def _fold_bn(gamma, beta, mean, var, eps=1e-5):
    scale = gamma * jax.lax.rsqrt(var + eps)
    bias = beta - mean * scale
    return scale, bias


def _reference(x_nchw, params, *, stride, padding):
    """Plain-JAX reference matching PyTorch semantics (eval-mode BN, ReLU)."""
    wdw, dws, dwb, wpw, pws, pwb = params
    kh, kw, c_in = wdw.shape
    x = jnp.transpose(x_nchw, (0, 2, 3, 1))
    dw = jax.lax.conv_general_dilated(
        x, wdw.reshape(kh, kw, 1, c_in), (stride, stride),
        [(padding, padding), (padding, padding)],
        dimension_numbers=("NHWC", "HWIO", "NHWC"),
        feature_group_count=c_in,
        precision=jax.lax.Precision.HIGHEST)
    dw = jnp.maximum(dw * dws + dwb, 0.0)
    # Default matmul precision (same bf16 MXU feed as the kernel's dot).
    pw = jnp.einsum("nhwc,co->nhwo", dw, wpw)
    pw = pw * pws + pwb
    return jnp.transpose(pw, (0, 3, 1, 2))


if __name__ == "__main__":
    # Module config: DepthWiseConv(in=4, out=8, k=3, stride=1, padding=1,
    #                              bias=False, act='relu', groups=in_channel)
    N, C_IN, C_OUT, H, W = 2, 4, 8, 16, 16
    K, STRIDE, PAD = 3, 1, 1

    key = jax.random.PRNGKey(0)
    ks = jax.random.split(key, 12)

    x = jax.random.normal(ks[0], (N, C_IN, H, W), jnp.float32)

    # depthwise conv weight (PyTorch (C_in,1,K,K)) -> (K,K,C_in); bias=False.
    wdw = 0.2 * jax.random.normal(ks[1], (K, K, C_IN), jnp.float32)
    # dw BatchNorm params (eval mode, running stats)
    dw_gamma = 1.0 + 0.1 * jax.random.normal(ks[2], (C_IN,), jnp.float32)
    dw_beta = 0.1 * jax.random.normal(ks[3], (C_IN,), jnp.float32)
    dw_mean = 0.1 * jax.random.normal(ks[4], (C_IN,), jnp.float32)
    dw_var = jax.nn.softplus(jax.random.normal(ks[5], (C_IN,), jnp.float32)) + 0.5

    # pointwise conv weight (PyTorch (C_out,C_in,1,1)) -> (C_in,C_out); bias=False.
    wpw = 0.2 * jax.random.normal(ks[6], (C_IN, C_OUT), jnp.float32)
    # pw BatchNorm params
    pw_gamma = 1.0 + 0.1 * jax.random.normal(ks[7], (C_OUT,), jnp.float32)
    pw_beta = 0.1 * jax.random.normal(ks[8], (C_OUT,), jnp.float32)
    pw_mean = 0.1 * jax.random.normal(ks[9], (C_OUT,), jnp.float32)
    pw_var = jax.nn.softplus(jax.random.normal(ks[10], (C_OUT,), jnp.float32)) + 0.5

    dws, dwb = _fold_bn(dw_gamma, dw_beta, dw_mean, dw_var)
    pws, pwb = _fold_bn(pw_gamma, pw_beta, pw_mean, pw_var)
    params = (wdw, dws, dwb, wpw, pws, pwb)

    out = depthwise_conv_forward(x, params, stride=STRIDE, padding=PAD)
    out = jax.block_until_ready(out)

    ref = jax.block_until_ready(_reference(x, params, stride=STRIDE, padding=PAD))
    assert out.shape == (N, C_OUT, H, W), out.shape
    # 1e-2 tolerance: the pointwise matmul runs the MXU at DEFAULT precision
    # (bf16 operand feed, f32 accumulate) per the performance review.
    assert jnp.allclose(out, ref, atol=1e-2, rtol=1e-2), float(
        jnp.max(jnp.abs(out - ref)))

    print("KERNEL_OK")
</pallas_src>

<mosaic_0001>
module attributes {stable_mosaic.version = 11 : i64} {
  func.func @_dw_sep_kernel(%arg0: i32, %arg1: i32, %arg2: memref<1x18x72xf32, #tpu.memory_space<vmem>>, %arg3: memref<9x64xf32, #tpu.memory_space<vmem>>, %arg4: memref<1x64xf32, #tpu.memory_space<vmem>>, %arg5: memref<1x64xf32, #tpu.memory_space<vmem>>, %arg6: memref<64x128xf32, #tpu.memory_space<vmem>>, %arg7: memref<1x128xf32, #tpu.memory_space<vmem>>, %arg8: memref<1x128xf32, #tpu.memory_space<vmem>>, %arg9: memref<1x8x128xf32, #tpu.memory_space<vmem>>) attributes {dimension_semantics = [#tpu.dimension_semantics<parallel>, #tpu.dimension_semantics<parallel>], iteration_bounds = array<i64: 2, 2>, scalar_prefetch = 0 : i64, scratch_operands = 0 : i64, tpu.core_type = #tpu.core_type<tc>, window_params = [{transform_indices = @transform_0, window_bounds = array<i64: 1, 18, 72>}, {pipeline_mode = #tpu.pipeline_mode<synchronous>, transform_indices = @transform_1, window_bounds = array<i64: 9, 64>}, {pipeline_mode = #tpu.pipeline_mode<synchronous>, transform_indices = @transform_2, window_bounds = array<i64: 1, 64>}, {pipeline_mode = #tpu.pipeline_mode<synchronous>, transform_indices = @transform_3, window_bounds = array<i64: 1, 64>}, {pipeline_mode = #tpu.pipeline_mode<synchronous>, transform_indices = @transform_4, window_bounds = array<i64: 64, 128>}, {pipeline_mode = #tpu.pipeline_mode<synchronous>, transform_indices = @transform_5, window_bounds = array<i64: 1, 128>}, {pipeline_mode = #tpu.pipeline_mode<synchronous>, transform_indices = @transform_6, window_bounds = array<i64: 1, 128>}, {transform_indices = @transform_7, window_bounds = array<i64: 1, 8, 128>}]} {
    %c8_i32 = arith.constant 8 : i32
    %0 = arith.muli %arg1, %c8_i32 : i32
    %1 = tpu.assume_multiple %0, 8 : i32
    %cst = arith.constant 0.000000e+00 : f32
    %2 = vector.broadcast %cst : f32 to vector<8x64xf32>
    %c0_i32 = arith.constant 0 : i32
    %3 = arith.addi %1, %c0_i32 : i32
    %c0 = arith.constant 0 : index
    %4 = arith.index_cast %3 : i32 to index
    %c0_0 = arith.constant 0 : index
    %5 = vector.load %arg2[%c0, %4, %c0_0] : memref<1x18x72xf32, #tpu.memory_space<vmem>>, vector<1x8x64xf32>
    %6 = vector.shape_cast %5 : vector<1x8x64xf32> to vector<8x64xf32>
    %c0_1 = arith.constant 0 : index
    %c0_2 = arith.constant 0 : index
    %7 = vector.load %arg3[%c0_1, %c0_2] : memref<9x64xf32, #tpu.memory_space<vmem>>, vector<1x64xf32>
    %8 = vector.shape_cast %7 : vector<1x64xf32> to vector<64xf32>
    %9 = vector.shape_cast %8 : vector<64xf32> to vector<1x64xf32>
    %10 = vector.broadcast %9 : vector<1x64xf32> to vector<8x64xf32>
    %11 = arith.mulf %6, %10 : vector<8x64xf32>
    %12 = arith.addf %2, %11 : vector<8x64xf32>
    %c0_i32_3 = arith.constant 0 : i32
    %13 = arith.addi %1, %c0_i32_3 : i32
    %c0_4 = arith.constant 0 : index
    %14 = arith.index_cast %13 : i32 to index
    %c4 = arith.constant 4 : index
    %15 = vector.load %arg2[%c0_4, %14, %c4] : memref<1x18x72xf32, #tpu.memory_space<vmem>>, vector<1x8x64xf32>
    %16 = vector.shape_cast %15 : vector<1x8x64xf32> to vector<8x64xf32>
    %c1 = arith.constant 1 : index
    %c0_5 = arith.constant 0 : index
    %17 = vector.load %arg3[%c1, %c0_5] : memref<9x64xf32, #tpu.memory_space<vmem>>, vector<1x64xf32>
    %18 = vector.shape_cast %17 : vector<1x64xf32> to vector<64xf32>
    %19 = vector.shape_cast %18 : vector<64xf32> to vector<1x64xf32>
    %20 = vector.broadcast %19 : vector<1x64xf32> to vector<8x64xf32>
    %21 = arith.mulf %16, %20 : vector<8x64xf32>
    %22 = arith.addf %12, %21 : vector<8x64xf32>
    %c0_i32_6 = arith.constant 0 : i32
    %23 = arith.addi %1, %c0_i32_6 : i32
    %c0_7 = arith.constant 0 : index
    %24 = arith.index_cast %23 : i32 to index
    %c8 = arith.constant 8 : index
    %25 = vector.load %arg2[%c0_7, %24, %c8] : memref<1x18x72xf32, #tpu.memory_space<vmem>>, vector<1x8x64xf32>
    %26 = vector.shape_cast %25 : vector<1x8x64xf32> to vector<8x64xf32>
    %c2 = arith.constant 2 : index
    %c0_8 = arith.constant 0 : index
    %27 = vector.load %arg3[%c2, %c0_8] : memref<9x64xf32, #tpu.memory_space<vmem>>, vector<1x64xf32>
    %28 = vector.shape_cast %27 : vector<1x64xf32> to vector<64xf32>
    %29 = vector.shape_cast %28 : vector<64xf32> to vector<1x64xf32>
    %30 = vector.broadcast %29 : vector<1x64xf32> to vector<8x64xf32>
    %31 = arith.mulf %26, %30 : vector<8x64xf32>
    %32 = arith.addf %22, %31 : vector<8x64xf32>
    %c1_i32 = arith.constant 1 : i32
    %33 = arith.addi %1, %c1_i32 : i32
    %c0_9 = arith.constant 0 : index
    %34 = arith.index_cast %33 : i32 to index
    %c0_10 = arith.constant 0 : index
    %35 = vector.load %arg2[%c0_9, %34, %c0_10] : memref<1x18x72xf32, #tpu.memory_space<vmem>>, vector<1x8x64xf32>
    %36 = vector.shape_cast %35 : vector<1x8x64xf32> to vector<8x64xf32>
    %c3 = arith.constant 3 : index
    %c0_11 = arith.constant 0 : index
    %37 = vector.load %arg3[%c3, %c0_11] : memref<9x64xf32, #tpu.memory_space<vmem>>, vector<1x64xf32>
    %38 = vector.shape_cast %37 : vector<1x64xf32> to vector<64xf32>
    %39 = vector.shape_cast %38 : vector<64xf32> to vector<1x64xf32>
    %40 = vector.broadcast %39 : vector<1x64xf32> to vector<8x64xf32>
    %41 = arith.mulf %36, %40 : vector<8x64xf32>
    %42 = arith.addf %32, %41 : vector<8x64xf32>
    %c1_i32_12 = arith.constant 1 : i32
    %43 = arith.addi %1, %c1_i32_12 : i32
    %c0_13 = arith.constant 0 : index
    %44 = arith.index_cast %43 : i32 to index
    %c4_14 = arith.constant 4 : index
    %45 = vector.load %arg2[%c0_13, %44, %c4_14] : memref<1x18x72xf32, #tpu.memory_space<vmem>>, vector<1x8x64xf32>
    %46 = vector.shape_cast %45 : vector<1x8x64xf32> to vector<8x64xf32>
    %c4_15 = arith.constant 4 : index
    %c0_16 = arith.constant 0 : index
    %47 = vector.load %arg3[%c4_15, %c0_16] : memref<9x64xf32, #tpu.memory_space<vmem>>, vector<1x64xf32>
    %48 = vector.shape_cast %47 : vector<1x64xf32> to vector<64xf32>
    %49 = vector.shape_cast %48 : vector<64xf32> to vector<1x64xf32>
    %50 = vector.broadcast %49 : vector<1x64xf32> to vector<8x64xf32>
    %51 = arith.mulf %46, %50 : vector<8x64xf32>
    %52 = arith.addf %42, %51 : vector<8x64xf32>
    %c1_i32_17 = arith.constant 1 : i32
    %53 = arith.addi %1, %c1_i32_17 : i32
    %c0_18 = arith.constant 0 : index
    %54 = arith.index_cast %53 : i32 to index
    %c8_19 = arith.constant 8 : index
    %55 = vector.load %arg2[%c0_18, %54, %c8_19] : memref<1x18x72xf32, #tpu.memory_space<vmem>>, vector<1x8x64xf32>
    %56 = vector.shape_cast %55 : vector<1x8x64xf32> to vector<8x64xf32>
    %c5 = arith.constant 5 : index
    %c0_20 = arith.constant 0 : index
    %57 = vector.load %arg3[%c5, %c0_20] : memref<9x64xf32, #tpu.memory_space<vmem>>, vector<1x64xf32>
    %58 = vector.shape_cast %57 : vector<1x64xf32> to vector<64xf32>
    %59 = vector.shape_cast %58 : vector<64xf32> to vector<1x64xf32>
    %60 = vector.broadcast %59 : vector<1x64xf32> to vector<8x64xf32>
    %61 = arith.mulf %56, %60 : vector<8x64xf32>
    %62 = arith.addf %52, %61 : vector<8x64xf32>
    %c2_i32 = arith.constant 2 : i32
    %63 = arith.addi %1, %c2_i32 : i32
    %c0_21 = arith.constant 0 : index
    %64 = arith.index_cast %63 : i32 to index
    %c0_22 = arith.constant 0 : index
    %65 = vector.load %arg2[%c0_21, %64, %c0_22] : memref<1x18x72xf32, #tpu.memory_space<vmem>>, vector<1x8x64xf32>
    %66 = vector.shape_cast %65 : vector<1x8x64xf32> to vector<8x64xf32>
    %c6 = arith.constant 6 : index
    %c0_23 = arith.constant 0 : index
    %67 = vector.load %arg3[%c6, %c0_23] : memref<9x64xf32, #tpu.memory_space<vmem>>, vector<1x64xf32>
    %68 = vector.shape_cast %67 : vector<1x64xf32> to vector<64xf32>
    %69 = vector.shape_cast %68 : vector<64xf32> to vector<1x64xf32>
    %70 = vector.broadcast %69 : vector<1x64xf32> to vector<8x64xf32>
    %71 = arith.mulf %66, %70 : vector<8x64xf32>
    %72 = arith.addf %62, %71 : vector<8x64xf32>
    %c2_i32_24 = arith.constant 2 : i32
    %73 = arith.addi %1, %c2_i32_24 : i32
    %c0_25 = arith.constant 0 : index
    %74 = arith.index_cast %73 : i32 to index
    %c4_26 = arith.constant 4 : index
    %75 = vector.load %arg2[%c0_25, %74, %c4_26] : memref<1x18x72xf32, #tpu.memory_space<vmem>>, vector<1x8x64xf32>
    %76 = vector.shape_cast %75 : vector<1x8x64xf32> to vector<8x64xf32>
    %c7 = arith.constant 7 : index
    %c0_27 = arith.constant 0 : index
    %77 = vector.load %arg3[%c7, %c0_27] : memref<9x64xf32, #tpu.memory_space<vmem>>, vector<1x64xf32>
    %78 = vector.shape_cast %77 : vector<1x64xf32> to vector<64xf32>
    %79 = vector.shape_cast %78 : vector<64xf32> to vector<1x64xf32>
    %80 = vector.broadcast %79 : vector<1x64xf32> to vector<8x64xf32>
    %81 = arith.mulf %76, %80 : vector<8x64xf32>
    %82 = arith.addf %72, %81 : vector<8x64xf32>
    %c2_i32_28 = arith.constant 2 : i32
    %83 = arith.addi %1, %c2_i32_28 : i32
    %c0_29 = arith.constant 0 : index
    %84 = arith.index_cast %83 : i32 to index
    %c8_30 = arith.constant 8 : index
    %85 = vector.load %arg2[%c0_29, %84, %c8_30] : memref<1x18x72xf32, #tpu.memory_space<vmem>>, vector<1x8x64xf32>
    %86 = vector.shape_cast %85 : vector<1x8x64xf32> to vector<8x64xf32>
    %c8_31 = arith.constant 8 : index
    %c0_32 = arith.constant 0 : index
    %87 = vector.load %arg3[%c8_31, %c0_32] : memref<9x64xf32, #tpu.memory_space<vmem>>, vector<1x64xf32>
    %88 = vector.shape_cast %87 : vector<1x64xf32> to vector<64xf32>
    %89 = vector.shape_cast %88 : vector<64xf32> to vector<1x64xf32>
    %90 = vector.broadcast %89 : vector<1x64xf32> to vector<8x64xf32>
    %91 = arith.mulf %86, %90 : vector<8x64xf32>
    %92 = arith.addf %82, %91 : vector<8x64xf32>
    %c0_33 = arith.constant 0 : index
    %c0_34 = arith.constant 0 : index
    %93 = vector.load %arg4[%c0_33, %c0_34] : memref<1x64xf32, #tpu.memory_space<vmem>>, vector<1x64xf32>
    %94 = vector.shape_cast %93 : vector<1x64xf32> to vector<64xf32>
    %95 = vector.shape_cast %94 : vector<64xf32> to vector<1x64xf32>
    %96 = vector.broadcast %95 : vector<1x64xf32> to vector<8x64xf32>
    %97 = arith.mulf %92, %96 : vector<8x64xf32>
    %c0_35 = arith.constant 0 : index
    %c0_36 = arith.constant 0 : index
    %98 = vector.load %arg5[%c0_35, %c0_36] : memref<1x64xf32, #tpu.memory_space<vmem>>, vector<1x64xf32>
    %99 = vector.shape_cast %98 : vector<1x64xf32> to vector<64xf32>
    %100 = vector.shape_cast %99 : vector<64xf32> to vector<1x64xf32>
    %101 = vector.broadcast %100 : vector<1x64xf32> to vector<8x64xf32>
    %102 = arith.addf %97, %101 : vector<8x64xf32>
    %cst_37 = arith.constant 0.000000e+00 : f32
    %103 = vector.broadcast %cst_37 : f32 to vector<8x64xf32>
    %104 = arith.maximumf %102, %103 : vector<8x64xf32>
    %c0_38 = arith.constant 0 : index
    %c0_39 = arith.constant 0 : index
    %105 = vector.load %arg6[%c0_38, %c0_39] : memref<64x128xf32, #tpu.memory_space<vmem>>, vector<64x128xf32>
    %cst_40 = arith.constant dense<0.000000e+00> : vector<8x128xf32>
    %106 = tpu.matmul %104, %105, %cst_40 {dimension_numbers = #tpu.dot_dimension_numbers<[1], [0], [0], [1], [0, 0, 1, 1], [], []>} : vector<8x64xf32>, vector<64x128xf32>, vector<8x128xf32> -> vector<8x128xf32>
    %c0_41 = arith.constant 0 : index
    %c0_42 = arith.constant 0 : index
    %107 = vector.load %arg7[%c0_41, %c0_42] : memref<1x128xf32, #tpu.memory_space<vmem>>, vector<1x128xf32>
    %108 = vector.shape_cast %107 : vector<1x128xf32> to vector<128xf32>
    %109 = vector.shape_cast %108 : vector<128xf32> to vector<1x128xf32>
    %110 = vector.broadcast %109 : vector<1x128xf32> to vector<8x128xf32>
    %111 = arith.mulf %106, %110 : vector<8x128xf32>
    %c0_43 = arith.constant 0 : index
    %c0_44 = arith.constant 0 : index
    %112 = vector.load %arg8[%c0_43, %c0_44] : memref<1x128xf32, #tpu.memory_space<vmem>>, vector<1x128xf32>
    %113 = vector.shape_cast %112 : vector<1x128xf32> to vector<128xf32>
    %114 = vector.shape_cast %113 : vector<128xf32> to vector<1x128xf32>
    %115 = vector.broadcast %114 : vector<1x128xf32> to vector<8x128xf32>
    %116 = arith.addf %111, %115 : vector<8x128xf32>
    %c0_45 = arith.constant 0 : index
    %c0_46 = arith.constant 0 : index
    %c0_47 = arith.constant 0 : index
    %117 = vector.load %arg9[%c0_45, %c0_46, %c0_47] : memref<1x8x128xf32, #tpu.memory_space<vmem>>, vector<1x8x128xf32>
    %118 = vector.shape_cast %117 : vector<1x8x128xf32> to vector<8x128xf32>
    %119 = vector.shape_cast %116 : vector<8x128xf32> to vector<1x8x128xf32>
    tpu.vector_store %arg9[%c0_45, %c0_46, %c0_47], %119 {strides = array<i32>} : memref<1x8x128xf32, #tpu.memory_space<vmem>>, vector<1x8x128xf32>,
    return
  }
  func.func @transform_0(%arg0: i32, %arg1: i32) -> (i32, i32, i32) {
    %c0_i32 = arith.constant 0 : i32
    %c0_i32_0 = arith.constant 0 : i32
    %c0_i32_1 = arith.constant 0 : i32
    return %arg0, %c0_i32, %c0_i32_0 : i32, i32, i32
  }
  func.func @transform_1(%arg0: i32, %arg1: i32) -> (i32, i32) {
    %c0_i32 = arith.constant 0 : i32
    %c0_i32_0 = arith.constant 0 : i32
    %c0_i32_1 = arith.constant 0 : i32
    return %c0_i32, %c0_i32_0 : i32, i32
  }
  func.func @transform_2(%arg0: i32, %arg1: i32) -> (i32, i32) {
    %c0_i32 = arith.constant 0 : i32
    %c0_i32_0 = arith.constant 0 : i32
    %c0_i32_1 = arith.constant 0 : i32
    return %c0_i32, %c0_i32_0 : i32, i32
  }
  func.func @transform_3(%arg0: i32, %arg1: i32) -> (i32, i32) {
    %c0_i32 = arith.constant 0 : i32
    %c0_i32_0 = arith.constant 0 : i32
    %c0_i32_1 = arith.constant 0 : i32
    return %c0_i32, %c0_i32_0 : i32, i32
  }
  func.func @transform_4(%arg0: i32, %arg1: i32) -> (i32, i32) {
    %c0_i32 = arith.constant 0 : i32
    %c0_i32_0 = arith.constant 0 : i32
    %c0_i32_1 = arith.constant 0 : i32
    return %c0_i32, %c0_i32_0 : i32, i32
  }
  func.func @transform_5(%arg0: i32, %arg1: i32) -> (i32, i32) {
    %c0_i32 = arith.constant 0 : i32
    %c0_i32_0 = arith.constant 0 : i32
    %c0_i32_1 = arith.constant 0 : i32
    return %c0_i32, %c0_i32_0 : i32, i32
  }
  func.func @transform_6(%arg0: i32, %arg1: i32) -> (i32, i32) {
    %c0_i32 = arith.constant 0 : i32
    %c0_i32_0 = arith.constant 0 : i32
    %c0_i32_1 = arith.constant 0 : i32
    return %c0_i32, %c0_i32_0 : i32, i32
  }
  func.func @transform_7(%arg0: i32, %arg1: i32) -> (i32, i32, i32) {
    %c0_i32 = arith.constant 0 : i32
    %c0_i32_0 = arith.constant 0 : i32
    return %arg0, %arg1, %c0_i32 : i32, i32, i32
  }
}

</mosaic_0001>

<bundles_post_ra>
// kernel: depthwise_conv_forward.1
= control target key start
LH: loop header
LB: loop body
LE: loop exit
PB: predicated region body
PF: predicated region fallthrough
CT: control target
= control target key end

     0   :  { %s827_s24 = smov 0   ;;  %s829_s25 = smov 0   ;;  %s954_s0 = inlined_call_operand.vmem [shape: f32[2,18,72], index: 0, kind: input, shape index: {}]   ;;  %s955_s1 = inlined_call_operand.vmem [shape: f32[9,64], index: 1, kind: input, shape index: {}]   ;;  %s956_s2 = inlined_call_operand.vmem [shape: f32[1,64], index: 2, kind: input, shape index: {}]   ;;  %s957_s3 = inlined_call_operand.vmem [shape: f32[1,64], index: 3, kind: input, shape index: {}]   ;;  %s958_s4 = inlined_call_operand.vmem [shape: f32[64,128], index: 4, kind: input, shape index: {}]   ;;  %s959_s5 = inlined_call_operand.vmem [shape: f32[1,128], index: 5, kind: input, shape index: {}]   ;;  %s960_s6 = inlined_call_operand.vmem [shape: f32[1,128], index: 6, kind: input, shape index: {}]   ;;  %s961_s7 = inlined_call_operand.vmem [shape: f32[2,16,128], index: 7, kind: output, shape index: {}]  }
   0x1   :  { %s831_s26 = smov 0   ;;  %s833_s27 = smov 0  }
   0x2   :  { %s835_s28 = smov 0  }
   0x3 LB: > { %s26_s29 = sadd.s32 1, %s770_s26  ;;  %s29_s30 = sadd.s32 1, %s774_s27  ;;  %s778_s28 = sphi %s835_s28, %s17_s28   ;;  %s774_s27 = sphi %s833_s27, %s965_s27   ;;  %s770_s26 = sphi %s831_s26, %s964_s26   ;;  %s766_s25 = sphi %s829_s25, %s963_s25   ;;  %s762_s24 = sphi %s827_s24, %s962_s24  }
   0x4   : > { %p27_p0 = scmp.ge.s32.totalorder %s26_s29, 2  ;;  %p627_p1 = scmp.ge.s32.totalorder %s778_s28, 1 }
   0x5   : > { %p251_p2 = scmp.lt.s32.totalorder %s778_s28, 5 }
   0x6   : > { %s967_s29 = smov (%p27_p0, %s26_s29), 0  ;;  %s969_s30 = smov (!%p27_p0, %s29_s30), %s774_s27 }
   0x7   : > { %p252_p3 = pnand %p627_p1, %p251_p2  ;;  %p31_p4 = scmp.ge.s32.totalorder %s969_s30, 2 }
   0x8   : > { %v633_v0 = vld [vmem:[%s955_s1 + $0x1] ss:$0 sm:$0xff] (!%p252_p3)  ;;  %s780_s10 = smov (!%p252_p3), 4   ;;  %v638_v1 = vld [vmem:[%s955_s1 + $0x4] ss:$0 sm:$0xff] (!%p252_p3)  ;;  %s781_s17 = smov (!%p252_p3), 8  }
   0x9   : > { %s971_s30 = smov (%p31_p4, %s969_s30), 0  ;;  %255 = sbr.rel (%p252_p3) target bundleno = 483 (0x1e3), region = 48 }
   0xa   : > { %315 = vrot.lane.b32.xlu0 (!%p252_p3), %v633_v0, %s780_s10  ;;  %v634_v2 = vld [vmem:[%s955_s1 + $0x2] ss:$0 sm:$0xff] (!%p252_p3)  ;;  %355 = vrot.lane.b32.xlu1 (!%p252_p3), %v638_v1, %s780_s10  ;;  %v639_v3 = vld [vmem:[%s955_s1 + $0x5] ss:$0 sm:$0xff] (!%p252_p3)  ;;  %p286_p5 = scmp.lt.s32.totalorder (!%p252_p3), %s766_s25, 1  ;;  %s631_s11 = sshll.u32 (!%p252_p3), %s762_s24, 3 }
   0xb   : > { %v643_v4 = vld [vmem:[%s955_s1 + $0x7] ss:$0 sm:$0xff] (!%p252_p3)  ;;  %v644_v5 = vld [vmem:[%s955_s1 + $0x8] ss:$0 sm:$0xff] (!%p252_p3)  ;;  %v782_v10 = vmov (!%p252_p3), 0.0|0.0   ;;  %v438_v13 = vld [vmem:[%s958_s4 + $0x10] sm:$0xff] (!%p252_p3) }
   0xc   : > { %v436_v6 = vld [vmem:[%s958_s4] sm:$0xff] (!%p252_p3)  ;;  %v437_v7 = vld [vmem:[%s958_s4 + $0x8] sm:$0xff] (!%p252_p3)  ;;  %680 = vmatprep.subr.bf16.mxu0 (!%p252_p3), %v782_v10  ;;  %v439_v14 = vld [vmem:[%s958_s4 + $0x18] sm:$0xff] (!%p252_p3)  ;;  %s783_s20 = smov (!%p252_p3), 124   ;;  %vm785_vm0 = vmmov (!%p252_p3), 0   ;;  %v786_v34 = vmov (!%p252_p3), 0.0  }
   0xd   : > { %v681_v8 = vpack.c.bf16 (!%p252_p3), %v437_v7, %v436_v6  ;;  %v684_v17 = vpack.c.bf16 (!%p252_p3), %v439_v14, %v438_v13  ;;  %v440_v20 = vld [vmem:[%s958_s4 + $0x20] sm:$0xff] (!%p252_p3)  ;;  %v441_v23 = vld [vmem:[%s958_s4 + $0x28] sm:$0xff] (!%p252_p3)  ;;  %v442_v28 = vld [vmem:[%s958_s4 + $0x30] sm:$0xff] (!%p252_p3)  ;;  %677 = vmatprep.mubr.msk.f32.mxu0 (!%p252_p3), %vm785_vm0, %v786_v34  ;;  %vm444_vm1 = vcmask (!%p252_p3), 523264   ;;  %p293_p6 = scmp.lt.s32.totalorder (!%p252_p3), %s762_s24, 1 }
   0xe   : > { %330 = vrot.lane.b32.xlu0 (!%p252_p3), %v634_v2, %s781_s17  ;;  %370 = vrot.lane.b32.xlu1 (!%p252_p3), %v639_v3, %s781_s17  ;;  %v687_v25 = vpack.c.bf16 (!%p252_p3), %v441_v23, %v440_v20  ;;  %v443_v29 = vld [vmem:[%s958_s4 + $0x38] sm:$0xff] (!%p252_p3)  ;;  %v632_v35 = vld [vmem:[%s955_s1] ss:$0 sm:$0xff] (!%p252_p3) }
   0xf   : > { %682 = vmatpush3.bf16.msra.mxu0 (!%p252_p3), %v681_v8  ;;  %v690_v32 = vpack.c.bf16 (!%p252_p3), %v443_v29, %v442_v28  ;;  %v637_v38 = vld [vmem:[%s955_s1 + $0x3] ss:$0 sm:$0xff] (!%p252_p3)  ;;  %v642_v43 = vld [vmem:[%s955_s1 + $0x6] ss:$0 sm:$0xff] (!%p252_p3)  ;;  %v645_v54 = vld [vmem:[%s956_s2] ss:$0 sm:$0xff] (!%p252_p3) }
  0x10   : > { %s973_s25 = smov (!%p286_p5, %s766_s25), 1  ;;  %683 = vmatprep.subr.bf16.mxu0 %v782_v10  ;;  %v646_v56 = vld [vmem:[%s957_s3] ss:$0 sm:$0xff]  ;;  %s975_s24 = smov (!%p293_p6, %s762_s24), 1 }
  0x11   : > { %s692_s22 = smul.u32 24, %s973_s25  ;;  %s629_s8 = sshll.u32 %s973_s25, 1  ;;  %v648_v60 = vld [vmem:[%s959_s5] ss:$0 sm:$0xff] }
  0x12   : > { %395 = vrot.lane.b32.xlu0 %v643_v4, %s780_s10  ;;  %410 = vrot.lane.b32.xlu1 %v644_v5, %s781_s17  ;;  %v649_v62 = vld [vmem:[%s960_s6] ss:$0 sm:$0xff] }
  0x13   : > { %s290_s9 = scalar_lea.vmem %s954_s0, %s692_s22  ;;  %685 = vmatpush3.bf16.msra.mxu0 %v684_v17 }
  0x14   : > { %s300_s12 = scalar_lea.vmem %s290_s9, %s631_s11  ;;  %686 = vmatprep.subr.bf16.mxu0 %v782_v10  ;;  %s784_s9 = smov 120  }
  0x15   : > { %v301_v9 = vld [vmem:[%s300_s12] sm:$0xff] }
  0x16   : > { %v636_v12 = vld [vmem:[%s300_s12 + $0x1] sm:$0xff]  ;;  %v307_v36 = vmul.f32 %v632_v35, %v301_v9 }
  0x17   : > { %v641_v24 = vld [vmem:[%s300_s12 + $0x2] sm:$0xff]  ;;  %688 = vmatpush3.bf16.msra.mxu0 %v687_v25  ;;  %v347_v40 = vmul.f32 %v637_v38, %v636_v12 }
  0x18   : > { %689 = vmatprep.subr.bf16.mxu0 %v782_v10  ;;  %v387_v48 = vmul.f32 %v642_v43, %v641_v24 }
  0x1b   : > { %691 = vmatpush3.bf16.msra.mxu0 %v690_v32 }
  0x7c   : > { %v316_v11 = vpop.permute.xlu0 %315  ;;  %v356_v16 = vpop.permute.xlu1 %355 }
  0x7d   : > { %v318_v15 = vmul.f32 %v316_v11, %v301_v9  ;;  %v358_v18 = vmul.f32 %v636_v12, %v356_v16 }
  0x7f   : > { %320 = vrot.lane.b32.xlu0 %v318_v15, %s783_s20 }
  0x80   : > { %v331_v19 = vpop.permute.xlu0 %330  ;;  %v371_v22 = vpop.permute.xlu1 %370 }
  0x81   : > { %v333_v21 = vmul.f32 %v331_v19, %v301_v9  ;;  %v373_v26 = vmul.f32 %v636_v12, %v371_v22 }
  0x83   : > { %335 = vrot.lane.b32.xlu1 %v333_v21, %s784_s9  ;;  %360 = vrot.lane.b32.xlu0 %v358_v18, %s783_s20 }
  0x84   : > { %v396_v27 = vpop.permute.xlu0 %395  ;;  %v411_v31 = vpop.permute.xlu1 %410 }
  0x85   : > { %v398_v30 = vmul.f32 %v641_v24, %v396_v27  ;;  %v413_v33 = vmul.f32 %v641_v24, %v411_v31 }
  0x87   : > { %375 = vrot.lane.b32.xlu1 %v373_v26, %s784_s9  ;;  %400 = vrot.lane.b32.xlu0 %v398_v30, %s783_s20 }
  0x8b   : > { %415 = vrot.lane.b32.xlu1 %v413_v33, %s784_s9  ;;  %s296_s9 = sadd.s32 %s629_s8, %s975_s24 }
  0x8c   : > { %s630_s14 = sshll.u32 %s296_s9, 3 }
  0x8d   : > { %s298_s17 = scalar_lea.vmem %s961_s7, %s630_s14 }
  0xf1   : > { %v321_v37 = vpop.permute.xlu0 %320 }
  0xf2   : > { %v323_v39 = vadd.f32 %v321_v37, %v307_v36 }
  0xf5   : > { %v336_v41 = vpop.permute.xlu1 %335  ;;  %v361_v45 = vpop.permute.xlu0 %360 }
  0xf6   : > { %v338_v42 = vadd.f32 %v336_v41, %v323_v39 }
  0xf8   : > { %v348_v44 = vadd.f32 %v347_v40, %v338_v42 }
  0xf9   : > { %v376_v46 = vpop.permute.xlu1 %375  ;;  %v401_v50 = vpop.permute.xlu0 %400 }
  0xfa   : > { %v363_v47 = vadd.f32 %v361_v45, %v348_v44 }
  0xfc   : > { %v378_v49 = vadd.f32 %v376_v46, %v363_v47 }
  0xfd   : > { %v416_v52 = vpop.permute.xlu1 %415 }
  0xfe   : > { %v388_v51 = vadd.f32 %v387_v48, %v378_v49 }
 0x100   : > { %v403_v53 = vadd.f32 %v401_v50, %v388_v51 }
 0x102   : > { %v418_v55 = vadd.f32 %v416_v52, %v403_v53 }
 0x104   : > { %v426_v57 = vmul.f32 %v645_v54, %v418_v55 }
 0x106   : > { %v434_v58 = vadd.f32 %v646_v56, %v426_v57 }
 0x108   : > { %v435_v59 = vmax.f32 %v434_v58, 0.0 }
 0x10a   : > { %678 = vmatmul.mubr.msk.f32.vlgmr.msra.gmra.mrb[0].mxu0 %vm444_vm1, %v435_v59 }
 0x1dd   : > { %v514_v61 = vpop.f32.mrb[0].mxu0 }
 0x1de   : > { %v525_v63 = vmul.f32 %v648_v60, %v514_v61  ;;  %v679_v0 = vpop.f32.mrb[1].mxu0 }
 0x1e0   : > { %v533_v1 = vadd.f32 %v649_v62, %v525_v63 }
 0x1e2   : > { %534 = vst [vmem:[%s298_s17] sm:$0xff] %v533_v1 }
 0x1e3 PF: > { %s17_s28 = sadd.s32 1, %s778_s28   ;;  %s962_s24 = smov %s770_s26 }
 0x1e4   : > { %p14_p7 = scmp.ge.s32.totalorder %s17_s28, 6   ;;  %s963_s25 = smov %s774_s27 }
 0x1e5   : > { %s964_s26 = smov %s967_s29  ;;  %s965_s27 = smov %s971_s30 }
 0x1e6   :  { %16 = sbr.rel (!%p14_p7) target bundleno = 3 (0x3), region = 81 }

</bundles_post_ra>
